<compile_context>
chip_gen: v7x
topology: tpu7x:2x2x1
jax: 0.10.0
libtpu: 0.0.40
codegen_flags: <defaults>
</compile_context>

<pallas_src>
import functools

import jax
import jax.numpy as jnp
from jax.experimental import pallas as pl
from jax.experimental.pallas import tpu as pltpu


def _round_up(a, b):
    return ((a + b - 1) // b) * b


def _dice_partial_kernel(x_ref, t_ref, cid_ref, o_ref, inter_acc, card_acc, *,
                         ignore_index, apply_softmax):
    """Grid (split, batch_group, pixel_chunk).

    Accumulates per-class intersection / cardinality partial sums for one
    (split, batch_group) into (C, 128) scratch; writes them out on the last
    pixel chunk.  Lane reduction is deferred to the JAX epilogue.
    """
    j = pl.program_id(2)

    @pl.when(j == 0)
    def _():
        inter_acc[...] = jnp.zeros_like(inter_acc)
        card_acc[...] = jnp.zeros_like(card_acc)

    x = x_ref[...].astype(jnp.float32)     # (Nb, C, rt, 128) cast in-register
    t = t_ref[...].astype(jnp.int32)       # (Nb, 1, rt, 128) widen in-register
    cid = cid_ref[...]                     # (1,  C, 1,  128) class-id constant

    if apply_softmax:
        # Fused per-pixel softmax over the class axis: exp/div hit the EUP
        # slot; the C-axis reduces are cheap leading-dim adds/maxes.
        m = jnp.max(x, axis=1, keepdims=True)
        e = jnp.exp(x - m)
        x = e / jnp.sum(e, axis=1, keepdims=True)

    # ignore_index pixels AND any padded / garbage-tail pixels carry
    # label == ignore_index (labels are padded in the wrapper), so a single
    # `valid` mask handles both -- no per-step positional iota needed.
    valid = t != ignore_index                         # (Nb, 1, rt, 128)
    sel = (t == cid) & valid                          # (Nb, C, rt, 128)

    xv = jnp.where(valid, x, 0.0)                     # pred_c (zeroes garbage)
    inter_term = jnp.where(sel, x, 0.0)               # pred_c * onehot_c
    card_term = xv + sel.astype(jnp.float32)          # pred_c + onehot_c

    # Batch-dim reduce (plain vector adds) then sublane reduce -> (C, 128).
    inter_acc[...] += jnp.sum(jnp.sum(inter_term, axis=0), axis=1)
    card_acc[...] += jnp.sum(jnp.sum(card_term, axis=0), axis=1)

    @pl.when(j == pl.num_programs(2) - 1)
    def _():
        o_ref[0, 0, 0] = inter_acc[...]
        o_ref[0, 0, 1] = card_acc[...]


def dice_loss(x_nchw, target_nhw, *, classes, loss_mode='negative_log',
              ignore_index=255, activation=None,
              block_bytes=4 * 1024 * 1024, smooth=1e-12):
    """Forward of DiceLoss. x_nchw: (N,C,H,W) float, target_nhw: (N,H,W) int."""
    N, C, H, W = x_nchw.shape
    assert C == classes
    HW = H * W

    # Activation handling: the common softmax-over-classes case is fused into
    # the kernel (saves a full HBM read+write of the activations).
    if activation is None:
        apply_softmax = False
    elif isinstance(activation, str) and activation.lower() == 'softmax':
        apply_softmax = True
    else:
        # TODO(synk): arbitrary callable activations run as a separate XLA pass
        # over the activations; pass activation='softmax' to fuse the common case.
        x_nchw = activation(x_nchw)
        apply_softmax = False

    # Labels keep their native integer dtype over HBM; widened in-register.
    if not jnp.issubdtype(target_nhw.dtype, jnp.integer):
        target_nhw = target_nhw.astype(jnp.int32)

    itemsize = jnp.dtype(x_nchw.dtype).itemsize

    # ---- tiling -----------------------------------------------------------
    HW128 = _round_up(HW, 128)          # lane padding (only if HW % 128 != 0)
    R = HW128 // 128                    # pixel rows of 128 lanes

    # Row tile from a byte budget (x block ~ block_bytes), multiple of 8.
    rows_budget = max(8, int(block_bytes // (C * 128 * itemsize)) // 8 * 8)
    rows_tile = R if R <= rows_budget else rows_budget   # full dim OK if R<8

    # Split the pixel axis across the two v7x TensorCores when the batch axis
    # alone gives poor core balance (odd / size-1 N).  No-op on 1-TC chips.
    num_splits = 2 if (N % 2 == 1 and R >= 16) else 1
    if num_splits == 2:
        rows_tile = min(rows_tile, _round_up(pl.cdiv(R, 2), 8))
    rows_tile = int(rows_tile)

    num_x_blocks = int(pl.cdiv(R, rows_tile))
    jpc = int(pl.cdiv(num_x_blocks, num_splits))     # pixel chunks per split
    rows_total = num_splits * jpc * rows_tile        # label row coverage
    max_xblk = num_x_blocks - 1

    # Tiny images: block several batch elements per grid step.
    nb = 1
    if num_x_blocks == 1 and num_splits == 1:
        per_image = C * rows_tile * 128 * itemsize
        max_nb = max(1, int(block_bytes // per_image))
        for d in range(min(N, max_nb), 0, -1):
            if N % d == 0:
                nb = d
                break
    ng = N // nb

    # ---- layout (free reshapes; pads only for ragged shapes) ---------------
    x3 = x_nchw.reshape(N, C, HW)
    if HW128 != HW:
        x3 = jnp.pad(x3, ((0, 0), (0, 0), (0, HW128 - HW)))
    x4 = x3.reshape(N, C, R, 128)

    t3 = target_nhw.reshape(N, 1, HW)
    lbl_hw = rows_total * 128
    if lbl_hw != HW:
        # Pad labels (only) with ignore_index so tail / out-of-range blocks
        # contribute exactly zero; x stays unpadded beyond the lane round-up.
        t3 = jnp.pad(t3, ((0, 0), (0, 0), (0, lbl_hw - HW)),
                     constant_values=ignore_index)
    t4 = t3.reshape(N, 1, rows_total, 128)

    # Tiny class-id constant (one vreg row per class), resident in VMEM.
    class_ids = jnp.broadcast_to(
        jnp.arange(C, dtype=jnp.int32).reshape(1, C, 1, 1), (1, C, 1, 128))

    kernel = functools.partial(_dice_partial_kernel,
                               ignore_index=ignore_index,
                               apply_softmax=apply_softmax)

    partials = pl.pallas_call(
        kernel,
        out_shape=jax.ShapeDtypeStruct((num_splits, ng, 2, C, 128), jnp.float32),
        grid_spec=pltpu.PrefetchScalarGridSpec(
            num_scalar_prefetch=0,
            grid=(num_splits, ng, jpc),
            in_specs=[
                pl.BlockSpec(
                    (nb, C, rows_tile, 128),
                    # Clamp: chunks past the real pixel extent re-read the last
                    # real block; their labels are all ignore_index -> zero.
                    lambda s, g, j: (g, 0, jnp.minimum(s * jpc + j, max_xblk), 0)),
                pl.BlockSpec(
                    (nb, 1, rows_tile, 128),
                    lambda s, g, j: (g, 0, s * jpc + j, 0)),
                pl.BlockSpec(
                    (1, C, 1, 128),
                    lambda s, g, j: (0, 0, 0, 0)),
            ],
            out_specs=pl.BlockSpec(
                (1, 1, 2, C, 128), lambda s, g, j: (s, g, 0, 0, 0)),
            scratch_shapes=[
                pltpu.VMEM((C, 128), jnp.float32),   # intersection accumulator
                pltpu.VMEM((C, 128), jnp.float32),   # cardinality accumulator
            ],
        ),
        compiler_params=pltpu.CompilerParams(
            dimension_semantics=("parallel", "parallel", "arbitrary"),
            vmem_limit_bytes=32 * 1024 * 1024),
    )(x4, t4, class_ids)

    # Tiny epilogue in plain JAX: final lane / split / batch-group reduce.
    sums = jnp.sum(partials, axis=(0, 1, 4))          # (2, C)
    inter, card = sums[0], sums[1]
    dice = 2.0 * inter / (card + smooth)
    if loss_mode == 'negative_log':
        return jnp.mean(-jnp.log(dice + 1e-12))
    elif loss_mode == 'one_minus':
        return jnp.mean(1.0 - dice)
    else:
        raise ValueError(
            "Loss mode unknown. Please use 'negative_log' or 'one_minus'!")


def _dice_loss_ref(x, t, *, classes, ignore_index=255,
                   loss_mode='negative_log', activation=None):
    """Pure-JAX reference for verification."""
    if activation is not None:
        x = activation(x)
    valid = (t != ignore_index)
    t_safe = jnp.where(valid, t, 0)
    onehot = jax.nn.one_hot(t_safe, classes, axis=1) * valid[:, None].astype(jnp.float32)
    pred = x.astype(jnp.float32) * valid[:, None].astype(jnp.float32)
    dims = (0, 2, 3)
    inter = jnp.sum(pred * onehot, axis=dims)
    card = jnp.sum(pred + onehot, axis=dims)
    dice = 2.0 * inter / (card + 1e-12)
    if loss_mode == 'negative_log':
        return jnp.mean(-jnp.log(dice + 1e-12))
    return jnp.mean(1.0 - dice)


if __name__ == "__main__":
    key = jax.random.PRNGKey(0)
    ignore_index = 255

    def make_case(k, N, C, H, W):
        k1, k2, k3 = jax.random.split(k, 3)
        logits = jax.random.normal(k1, (N, C, H, W), dtype=jnp.float32)
        labels = jax.random.randint(k2, (N, H, W), 0, C, dtype=jnp.int32)
        ign = jax.random.uniform(k3, (N, H, W)) < 0.1
        labels = jnp.where(ign, ignore_index, labels)
        return logits, labels

    ks = jax.random.split(key, 4)

    # Case 1: module defaults (activation=None -> feed probabilities), both modes.
    logits, labels = make_case(ks[0], 2, 4, 16, 16)
    probs = jax.nn.softmax(logits, axis=1)
    for mode in ('negative_log', 'one_minus'):
        out = jax.block_until_ready(
            dice_loss(probs, labels, classes=4, loss_mode=mode,
                      ignore_index=ignore_index))
        ref = _dice_loss_ref(probs, labels, classes=4, loss_mode=mode,
                             ignore_index=ignore_index)
        assert jnp.allclose(out, ref, rtol=1e-5, atol=1e-5), (mode, out, ref)

    # Case 2: fused in-kernel softmax + ragged HW (exercises lane/label padding).
    logits, labels = make_case(ks[1], 1, 3, 12, 20)
    out = jax.block_until_ready(
        dice_loss(logits, labels, classes=3, activation='softmax',
                  ignore_index=ignore_index))
    ref = _dice_loss_ref(logits, labels, classes=3, ignore_index=ignore_index,
                         activation=lambda z: jax.nn.softmax(z, axis=1))
    assert jnp.allclose(out, ref, rtol=1e-5, atol=1e-5), (out, ref)

    # Case 3: batch of 1 -> two-way pixel-axis split (v7x megacore path).
    logits, labels = make_case(ks[2], 1, 2, 64, 64)
    probs = jax.nn.softmax(logits, axis=1)
    out = jax.block_until_ready(
        dice_loss(probs, labels, classes=2, ignore_index=ignore_index))
    ref = _dice_loss_ref(probs, labels, classes=2, ignore_index=ignore_index)
    assert jnp.allclose(out, ref, rtol=1e-5, atol=1e-5), (out, ref)

    # Case 4: multi-chunk accumulation (small block budget forces several
    # pixel chunks per batch element).
    logits, labels = make_case(ks[3], 2, 4, 128, 128)
    probs = jax.nn.softmax(logits, axis=1)
    out = jax.block_until_ready(
        dice_loss(probs, labels, classes=4, ignore_index=ignore_index,
                  block_bytes=64 * 1024))
    ref = _dice_loss_ref(probs, labels, classes=4, ignore_index=ignore_index)
    assert jnp.allclose(out, ref, rtol=1e-5, atol=1e-5), (out, ref)

    print("KERNEL_OK")
</pallas_src>

<mosaic_0001>
module attributes {stable_mosaic.version = 11 : i64} {
  func.func @_dice_partial_kernel(%arg0: i32, %arg1: i32, %arg2: i32, %arg3: memref<2x4x2x128xf32, #tpu.memory_space<vmem>>, %arg4: memref<2x1x2x128xi32, #tpu.memory_space<vmem>>, %arg5: memref<1x4x1x128xi32, #tpu.memory_space<vmem>>, %arg6: memref<1x1x2x4x128xf32, #tpu.memory_space<vmem>>, %arg7: memref<4x128xf32, #tpu.memory_space<vmem>>, %arg8: memref<4x128xf32, #tpu.memory_space<vmem>>) attributes {dimension_semantics = [#tpu.dimension_semantics<parallel>, #tpu.dimension_semantics<parallel>, #tpu.dimension_semantics<arbitrary>], iteration_bounds = array<i64: 1, 1, 1>, scalar_prefetch = 0 : i64, scratch_operands = 2 : i64, tpu.core_type = #tpu.core_type<tc>, window_params = [{transform_indices = @transform_0, window_bounds = array<i64: 2, 4, 2, 128>}, {transform_indices = @transform_1, window_bounds = array<i64: 2, 1, 2, 128>}, {pipeline_mode = #tpu.pipeline_mode<synchronous>, transform_indices = @transform_2, window_bounds = array<i64: 1, 4, 1, 128>}, {transform_indices = @transform_3, window_bounds = array<i64: 1, 1, 2, 4, 128>}]} {
    %c0_i32 = arith.constant 0 : i32
    %0 = arith.cmpi eq, %arg2, %c0_i32 : i32
    %1 = arith.extui %0 : i1 to i32
    %c0_i32_0 = arith.constant 0 : i32
    %2 = arith.cmpi ne, %1, %c0_i32_0 : i32
    scf.if %2 {
      %cst_27 = arith.constant 0.000000e+00 : f32
      %35 = vector.broadcast %cst_27 : f32 to vector<4x128xf32>
      %c0_28 = arith.constant 0 : index
      %c0_29 = arith.constant 0 : index
      %36 = vector.load %arg7[%c0_28, %c0_29] : memref<4x128xf32, #tpu.memory_space<vmem>>, vector<4x128xf32>
      tpu.vector_store %arg7[%c0_28, %c0_29], %35 {strides = array<i32>} : memref<4x128xf32, #tpu.memory_space<vmem>>, vector<4x128xf32>,
      %cst_30 = arith.constant 0.000000e+00 : f32
      %37 = vector.broadcast %cst_30 : f32 to vector<4x128xf32>
      %c0_31 = arith.constant 0 : index
      %c0_32 = arith.constant 0 : index
      %38 = vector.load %arg8[%c0_31, %c0_32] : memref<4x128xf32, #tpu.memory_space<vmem>>, vector<4x128xf32>
      tpu.vector_store %arg8[%c0_31, %c0_32], %37 {strides = array<i32>} : memref<4x128xf32, #tpu.memory_space<vmem>>, vector<4x128xf32>,
    } else {
    }
    %c0 = arith.constant 0 : index
    %c0_1 = arith.constant 0 : index
    %c0_2 = arith.constant 0 : index
    %c0_3 = arith.constant 0 : index
    %3 = vector.load %arg3[%c0, %c0_1, %c0_2, %c0_3] : memref<2x4x2x128xf32, #tpu.memory_space<vmem>>, vector<2x4x2x128xf32>
    %c0_4 = arith.constant 0 : index
    %c0_5 = arith.constant 0 : index
    %c0_6 = arith.constant 0 : index
    %c0_7 = arith.constant 0 : index
    %4 = vector.load %arg4[%c0_4, %c0_5, %c0_6, %c0_7] : memref<2x1x2x128xi32, #tpu.memory_space<vmem>>, vector<2x1x2x128xi32>
    %c0_8 = arith.constant 0 : index
    %c0_9 = arith.constant 0 : index
    %c0_10 = arith.constant 0 : index
    %c0_11 = arith.constant 0 : index
    %5 = vector.load %arg5[%c0_8, %c0_9, %c0_10, %c0_11] : memref<1x4x1x128xi32, #tpu.memory_space<vmem>>, vector<1x4x1x128xi32>
    %c255_i32 = arith.constant 255 : i32
    %6 = vector.broadcast %c255_i32 : i32 to vector<2x1x2x128xi32>
    %7 = arith.cmpi ne, %4, %6 : vector<2x1x2x128xi32>
    %8 = vector.broadcast %4 : vector<2x1x2x128xi32> to vector<2x4x2x128xi32>
    %9 = vector.broadcast %5 : vector<1x4x1x128xi32> to vector<2x4x2x128xi32>
    %10 = arith.cmpi eq, %8, %9 : vector<2x4x2x128xi32>
    %11 = vector.broadcast %7 : vector<2x1x2x128xi1> to vector<2x4x2x128xi1>
    %12 = arith.andi %10, %11 : vector<2x4x2x128xi1>
    %cst = arith.constant 0.000000e+00 : f32
    %13 = vector.shape_cast %7 : vector<2x1x2x128xi1> to vector<2x1x2x128xi1>
    %14 = vector.broadcast %13 : vector<2x1x2x128xi1> to vector<2x4x2x128xi1>
    %15 = vector.broadcast %cst : f32 to vector<2x4x2x128xf32>
    %16 = arith.select %14, %3, %15 : vector<2x4x2x128xi1>, vector<2x4x2x128xf32>
    %cst_12 = arith.constant 0.000000e+00 : f32
    %17 = vector.broadcast %cst_12 : f32 to vector<2x4x2x128xf32>
    %18 = arith.select %12, %3, %17 : vector<2x4x2x128xi1>, vector<2x4x2x128xf32>
    %19 = arith.extui %12 : vector<2x4x2x128xi1> to vector<2x4x2x128xi32>
    %20 = arith.sitofp %19 : vector<2x4x2x128xi32> to vector<2x4x2x128xf32>
    %21 = arith.addf %16, %20 : vector<2x4x2x128xf32>
    %c0_13 = arith.constant 0 : index
    %c0_14 = arith.constant 0 : index
    %22 = vector.load %arg7[%c0_13, %c0_14] : memref<4x128xf32, #tpu.memory_space<vmem>>, vector<4x128xf32>
    %cst_15 = arith.constant dense<0.000000e+00> : vector<4x2x128xf32>
    %23 = vector.multi_reduction <add>, %18, %cst_15 [0] : vector<2x4x2x128xf32> to vector<4x2x128xf32>
    %cst_16 = arith.constant dense<0.000000e+00> : vector<4x128xf32>
    %24 = vector.multi_reduction <add>, %23, %cst_16 [1] : vector<4x2x128xf32> to vector<4x128xf32>
    %25 = arith.addf %22, %24 : vector<4x128xf32>
    %c0_17 = arith.constant 0 : index
    %c0_18 = arith.constant 0 : index
    %26 = vector.load %arg7[%c0_17, %c0_18] : memref<4x128xf32, #tpu.memory_space<vmem>>, vector<4x128xf32>
    tpu.vector_store %arg7[%c0_17, %c0_18], %25 {strides = array<i32>} : memref<4x128xf32, #tpu.memory_space<vmem>>, vector<4x128xf32>,
    %c0_19 = arith.constant 0 : index
    %c0_20 = arith.constant 0 : index
    %27 = vector.load %arg8[%c0_19, %c0_20] : memref<4x128xf32, #tpu.memory_space<vmem>>, vector<4x128xf32>
    %cst_21 = arith.constant dense<0.000000e+00> : vector<4x2x128xf32>
    %28 = vector.multi_reduction <add>, %21, %cst_21 [0] : vector<2x4x2x128xf32> to vector<4x2x128xf32>
    %cst_22 = arith.constant dense<0.000000e+00> : vector<4x128xf32>
    %29 = vector.multi_reduction <add>, %28, %cst_22 [1] : vector<4x2x128xf32> to vector<4x128xf32>
    %30 = arith.addf %27, %29 : vector<4x128xf32>
    %c0_23 = arith.constant 0 : index
    %c0_24 = arith.constant 0 : index
    %31 = vector.load %arg8[%c0_23, %c0_24] : memref<4x128xf32, #tpu.memory_space<vmem>>, vector<4x128xf32>
    tpu.vector_store %arg8[%c0_23, %c0_24], %30 {strides = array<i32>} : memref<4x128xf32, #tpu.memory_space<vmem>>, vector<4x128xf32>,
    %c0_i32_25 = arith.constant 0 : i32
    %32 = arith.cmpi eq, %arg2, %c0_i32_25 : i32
    %33 = arith.extui %32 : i1 to i32
    %c0_i32_26 = arith.constant 0 : i32
    %34 = arith.cmpi ne, %33, %c0_i32_26 : i32
    scf.if %34 {
      %c0_27 = arith.constant 0 : index
      %c0_28 = arith.constant 0 : index
      %35 = vector.load %arg7[%c0_27, %c0_28] : memref<4x128xf32, #tpu.memory_space<vmem>>, vector<4x128xf32>
      %c0_29 = arith.constant 0 : index
      %c0_30 = arith.constant 0 : index
      %c0_31 = arith.constant 0 : index
      %c0_32 = arith.constant 0 : index
      %c0_33 = arith.constant 0 : index
      %36 = vector.load %arg6[%c0_29, %c0_30, %c0_31, %c0_32, %c0_33] : memref<1x1x2x4x128xf32, #tpu.memory_space<vmem>>, vector<1x1x1x4x128xf32>
      %37 = vector.shape_cast %36 : vector<1x1x1x4x128xf32> to vector<4x128xf32>
      %38 = vector.shape_cast %35 : vector<4x128xf32> to vector<1x1x1x4x128xf32>
      tpu.vector_store %arg6[%c0_29, %c0_30, %c0_31, %c0_32, %c0_33], %38 {strides = array<i32>} : memref<1x1x2x4x128xf32, #tpu.memory_space<vmem>>, vector<1x1x1x4x128xf32>,
      %c0_34 = arith.constant 0 : index
      %c0_35 = arith.constant 0 : index
      %39 = vector.load %arg8[%c0_34, %c0_35] : memref<4x128xf32, #tpu.memory_space<vmem>>, vector<4x128xf32>
      %c0_36 = arith.constant 0 : index
      %c0_37 = arith.constant 0 : index
      %c1 = arith.constant 1 : index
      %c0_38 = arith.constant 0 : index
      %c0_39 = arith.constant 0 : index
      %40 = vector.load %arg6[%c0_36, %c0_37, %c1, %c0_38, %c0_39] : memref<1x1x2x4x128xf32, #tpu.memory_space<vmem>>, vector<1x1x1x4x128xf32>
      %41 = vector.shape_cast %40 : vector<1x1x1x4x128xf32> to vector<4x128xf32>
      %42 = vector.shape_cast %39 : vector<4x128xf32> to vector<1x1x1x4x128xf32>
      tpu.vector_store %arg6[%c0_36, %c0_37, %c1, %c0_38, %c0_39], %42 {strides = array<i32>} : memref<1x1x2x4x128xf32, #tpu.memory_space<vmem>>, vector<1x1x1x4x128xf32>,
    } else {
    }
    return
  }
  func.func @transform_0(%arg0: i32, %arg1: i32, %arg2: i32) -> (i32, i32, i32, i32) {
    %c1_i32 = arith.constant 1 : i32
    %0 = arith.muli %arg0, %c1_i32 : i32
    %1 = arith.addi %0, %arg2 : i32
    %c0_i32 = arith.constant 0 : i32
    %2 = arith.minsi %1, %c0_i32 : i32
    %c0_i32_0 = arith.constant 0 : i32
    %c0_i32_1 = arith.constant 0 : i32
    %c0_i32_2 = arith.constant 0 : i32
    return %arg1, %c0_i32_0, %2, %c0_i32_1 : i32, i32, i32, i32
  }
  func.func @transform_1(%arg0: i32, %arg1: i32, %arg2: i32) -> (i32, i32, i32, i32) {
    %c1_i32 = arith.constant 1 : i32
    %0 = arith.muli %arg0, %c1_i32 : i32
    %1 = arith.addi %0, %arg2 : i32
    %c0_i32 = arith.constant 0 : i32
    %c0_i32_0 = arith.constant 0 : i32
    %c0_i32_1 = arith.constant 0 : i32
    return %arg1, %c0_i32, %1, %c0_i32_0 : i32, i32, i32, i32
  }
  func.func @transform_2(%arg0: i32, %arg1: i32, %arg2: i32) -> (i32, i32, i32, i32) {
    %c0_i32 = arith.constant 0 : i32
    %c0_i32_0 = arith.constant 0 : i32
    %c0_i32_1 = arith.constant 0 : i32
    %c0_i32_2 = arith.constant 0 : i32
    %c0_i32_3 = arith.constant 0 : i32
    return %c0_i32, %c0_i32_0, %c0_i32_1, %c0_i32_2 : i32, i32, i32, i32
  }
  func.func @transform_3(%arg0: i32, %arg1: i32, %arg2: i32) -> (i32, i32, i32, i32, i32) {
    %c0_i32 = arith.constant 0 : i32
    %c0_i32_0 = arith.constant 0 : i32
    %c0_i32_1 = arith.constant 0 : i32
    %c0_i32_2 = arith.constant 0 : i32
    return %arg0, %arg1, %c0_i32, %c0_i32_0, %c0_i32_1 : i32, i32, i32, i32, i32
  }
}

</mosaic_0001>

<bundles_post_ra>
// kernel: tpu_custom_call.1
= control target key start
LH: loop header
LB: loop body
LE: loop exit
PB: predicated region body
PF: predicated region fallthrough
CT: control target
= control target key end

     0   :  { %8 = vsyncpa [#allocation5], 0  ;;  %s580_s0 = inlined_call_operand.hbm [shape: f32[2,4,2,128], index: 0, kind: input, shape index: {}]   ;;  %s581_s1 = inlined_call_operand.hbm [shape: s32[2,1,2,128], index: 1, kind: input, shape index: {}]   ;;  %s582_s2 = inlined_call_operand.vmem [shape: s32[1,4,1,128], index: 2, kind: input, shape index: {}]   ;;  %s583_s3 = inlined_call_operand.hbm [shape: f32[1,1,2,4,128], index: 3, kind: output, shape index: {}]  }
   0x1   :  { %9 = vsyncpa [#allocation8], 0 }
   0x2   :  { %10 = vsyncpa [#allocation6], 0  ;;  %s379_s12 = smov [#allocation4]   ;;  %s307_s16 = scalar_lea.hbm %s580_s0, 256 }
   0x3   :  { %s21_s13 = sshll.u32 %s379_s12, 4  ;;  %p308_p0 = scmp.ne.s32.totalorder %s580_s0, %s307_s16  ;;  %s22_s13 = int_to_ptr.vmem [resolvable:$true] %s21_s13 }
   0x4   :  { %p311_p1 = scmp.lt.u32.totalorder %s307_s16, %s580_s0 }
   0x6   :  { %p313_p2 = pnand %p311_p1, %p308_p0 }
   0x8   :  { %316 = shalt.err (!%p313_p2)
}
   0x9   :  { %s317_s21 = scalar_lea.vmem %s22_s13, 256  ;;  %p322_p4 = scmp.lt.s32.totalorder %s22_s13, %s22_s13 }
   0xa   :  { %p318_p3 = scmp.ne.s32.totalorder %s22_s13, %s317_s21  ;;  %p323_p5 = scmp.lt.s32.totalorder %s317_s21, %s317_s21 }
   0xc   :  { %p324_p6 = por %p323_p5, %p322_p4 }
   0xe   :  { %p325_p7 = pnand %p324_p6, %p318_p3 }
  0x10   :  { %328 = shalt.err (!%p325_p7)
}
  0x11   :  { %s380_s22 = smov 32   ;;  %s381_s23 = smov 2  }
  0x12   :  { %27 = dma.hbm_to_vmem [thread:$0]  %s580_s0, 256, %s22_s13, [#allocation5], %s380_s22, %s380_s22, %s381_s23  }
  0x13   :  { %s382_s26 = smov [#allocation7]   ;;  %s329_s30 = scalar_lea.hbm %s581_s1, 64 }
  0x14   :  { %s36_s27 = sshll.u32 %s382_s26, 4  ;;  %p330_p8 = scmp.ne.s32.totalorder %s581_s1, %s329_s30  ;;  %s37_s27 = int_to_ptr.vmem [resolvable:$true] %s36_s27 }
  0x15   :  { %p333_p9 = scmp.lt.u32.totalorder %s329_s30, %s581_s1 }
  0x17   :  { %p335_p10 = pnand %p333_p9, %p330_p8 }
  0x19   :  { %338 = shalt.err (!%p335_p10)
}
  0x1a   :  { %s339_s8 = scalar_lea.vmem %s37_s27, 64  ;;  %p344_p12 = scmp.lt.s32.totalorder %s37_s27, %s37_s27 }
  0x1b   :  { %p340_p11 = scmp.ne.s32.totalorder %s37_s27, %s339_s8  ;;  %p345_p13 = scmp.lt.s32.totalorder %s339_s8, %s339_s8 }
  0x1d   :  { %p346_p0 = por %p345_p13, %p344_p12 }
  0x1f   :  { %p347_p1 = pnand %p346_p0, %p340_p11 }
  0x21   :  { %350 = shalt.err (!%p347_p1)
}
  0x22   :  { %42 = dma.hbm_to_vmem [thread:$0]  %s581_s1, 64, %s37_s27, [#allocation8], %s380_s22, %s380_s22, %s381_s23  }
  0x23   :  { %373 = dma.done.wait [#allocation5], 256  }
  0x24   :  { %374 = vsyncadd [#allocation5], 4294967040 }
  0x25   :  { %375 = dma.done.wait [#allocation8], 64  }
  0x26   :  { %376 = vsyncadd [#allocation8], 4294967232  ;;  %v383_v0 = vmov 0.0   ;;  %v61_v1 = vld [vmem:[#allocation4] sm:$0x3]  ;;  %vm154_vm0 = vcmask 1041408  }
  0x27   :  { %59 = vst [vmem:[#allocation2] sm:$0xf] %v383_v0  ;;  %60 = vst [vmem:[#allocation3] sm:$0xf] %v383_v0  ;;  %v62_v2 = vld [vmem:[#allocation4 + $0x2] sm:$0x3] }
  0x28   :  { %v63_v3 = vld [vmem:[#allocation4 + $0x4] sm:$0x3]  ;;  %v69_v4 = vld [vmem:[#allocation7] sm:$0x3]  ;;  %v70_v5 = vld [vmem:[#allocation7 + $0x2] sm:$0x3] }
  0x29   :  { %v287_v6 = vld [vmem:[%s582_s2] ss:$0 sm:$0xff]  ;;  %v288_v7 = vld [vmem:[%s582_s2 + $0x1] ss:$0 sm:$0xff]  ;;  %v289_v8 = vld [vmem:[%s582_s2 + $0x2] ss:$0 sm:$0xff] }
  0x2a   :  { %v290_v9 = vld [vmem:[%s582_s2 + $0x3] ss:$0 sm:$0xff]  ;;  %vm75_vm1 = vcmp.ne.s32.totalorder %v69_v4, 255  ;;  %vm76_vm2 = vcmp.ne.s32.totalorder %v70_v5, 255  ;;  %vm93_vm3 = vcmp.eq.s32.totalorder %v69_v4, %v287_v6  ;;  %vm94_vm4 = vcmp.eq.s32.totalorder %v69_v4, %v288_v7  ;;  %v64_v10 = vld [vmem:[#allocation4 + $0x6] sm:$0x3] }
  0x2b   :  { %v65_v11 = vld [vmem:[#allocation4 + $0x8] sm:$0x3]  ;;  %vm95_vm5 = vcmp.eq.s32.totalorder %v69_v4, %v289_v8  ;;  %vm96_vm6 = vcmp.eq.s32.totalorder %v69_v4, %v290_v9  ;;  %vm97_vm7 = vcmp.eq.s32.totalorder %v70_v5, %v287_v6  ;;  %vm98_vm8 = vcmp.eq.s32.totalorder %v70_v5, %v288_v7  ;;  %vm446_vm9 = vmand %vm93_vm3, %vm75_vm1  ;;  %v66_v13 = vld [vmem:[#allocation4 + $0xa] sm:$0x3]  ;;  %s384_s2 = smov [#allocation9]  }
  0x2c   :  { %v67_v14 = vld [vmem:[#allocation4 + $0xc] sm:$0x3]  ;;  %vm99_vm10 = vcmp.eq.s32.totalorder %v70_v5, %v289_v8  ;;  %vm100_vm11 = vcmp.eq.s32.totalorder %v70_v5, %v290_v9  ;;  %vm451_vm12 = vmand %vm94_vm4, %vm75_vm1  ;;  %v121_v16 = vsel %vm446_vm9, %v61_v1, 0.0  ;;  %v113_v17 = vsel %vm75_vm1, %v61_v1, 0.0  ;;  %v68_v18 = vld [vmem:[#allocation4 + $0xe] sm:$0x3] }
  0x2d   :  { %vm459_vm13 = vmand %vm95_vm5, %vm75_vm1  ;;  %v122_v20 = vsel %vm451_vm12, %v62_v2, 0.0  ;;  %v155_v21 = vsel %vm154_vm0, %v121_v16, 0.0  ;;  %v114_v22 = vsel %vm75_vm1, %v62_v2, 0.0  ;;  %v115_v23 = vsel %vm75_vm1, %v63_v3, 0.0  ;;  %s272_s17 = sshll.u32 %s384_s2, 4  ;;  %s273_s17 = int_to_ptr.vmem [resolvable:$true] %s272_s17 }
  0x2e   :  { %vm470_vm14 = vmand %vm96_vm6, %vm75_vm1  ;;  %v123_v25 = vsel %vm459_vm13, %v63_v3, 0.0  ;;  %v158_v26 = vsel %vm154_vm0, %v122_v20, 0.0  ;;  %v116_v27 = vsel %vm75_vm1, %v64_v10, 0.0  ;;  %v117_v28 = vsel %vm76_vm2, %v65_v11, 0.0  ;;  %s351_s18 = scalar_lea.vmem %s273_s17, 128  ;;  %p356_p3 = scmp.lt.s32.totalorder %s273_s17, %s273_s17 }
  0x2f   :  { %vm481_vm15 = vmand %vm97_vm7, %vm76_vm2  ;;  %v124_v30 = vsel %vm470_vm14, %v64_v10, 0.0  ;;  %v161_v31 = vsel %vm154_vm0, %v123_v25, 0.0  ;;  %v118_v32 = vsel %vm76_vm2, %v66_v13, 0.0  ;;  %v119_v33 = vsel %vm76_vm2, %v67_v14, 0.0  ;;  %p352_p2 = scmp.ne.s32.totalorder %s273_s17, %s351_s18  ;;  %p357_p4 = scmp.lt.s32.totalorder %s351_s18, %s351_s18 }
  0x30   :  { %vm492_vm1 = vmand %vm98_vm8, %vm76_vm2  ;;  %v125_v35 = vsel %vm481_vm15, %v65_v11, 0.0  ;;  %v164_v36 = vsel %vm154_vm0, %v124_v30, 0.0  ;;  %v120_v37 = vsel %vm76_vm2, %v68_v18, 0.0  ;;  %v291_v38 = vsel %vm446_vm9, 1.0, %v383_v0 }
  0x31   :  { %vm505_vm3 = vmand %vm99_vm10, %vm76_vm2  ;;  %v126_v40 = vsel %vm492_vm1, %v66_v13, 0.0  ;;  %v156_v41 = vsel %vm154_vm0, %v125_v35, 0.0  ;;  %v292_v42 = vsel %vm451_vm12, 1.0, %v383_v0  ;;  %v293_v43 = vsel %vm459_vm13, 1.0, %v383_v0  ;;  %p358_p5 = por %p357_p4, %p356_p3 }
  0x32   :  { %vm520_vm4 = vmand %vm100_vm11, %vm76_vm2  ;;  %v127_v45 = vsel %vm505_vm3, %v67_v14, 0.0  ;;  %v157_v46 = vadd.f32 %v156_v41, %v155_v21  ;;  %v159_v47 = vsel %vm154_vm0, %v126_v40, 0.0  ;;  %v294_v48 = vsel %vm470_vm14, 1.0, %v383_v0 }
  0x33   :  { %v128_v49 = vsel %vm520_vm4, %v68_v18, 0.0  ;;  %v160_v50 = vadd.f32 %v159_v47, %v158_v26  ;;  %v162_v51 = vsel %vm154_vm0, %v127_v45, 0.0  ;;  %v295_v52 = vsel %vm481_vm15, 1.0, %v383_v0  ;;  %v153_v45 = vld [vmem:[#allocation2] sm:$0xf]  ;;  %p359_p6 = pnand %p358_p5, %p352_p2 }
  0x34   :  { %v163_v53 = vadd.f32 %v162_v51, %v161_v31  ;;  %v165_v54 = vsel %vm154_vm0, %v128_v49, 0.0  ;;  %v167_v55 = vsel %vm154_vm0, %v157_v46, 0.0  ;;  %v296_v56 = vsel %vm492_vm1, 1.0, %v383_v0 }
  0x35   :  { %v166_v57 = vadd.f32 %v165_v54, %v164_v36  ;;  %v168_v58 = vrot.slane %v167_v55, 4  ;;  %v174_v59 = vsel %vm154_vm0, %v160_v50, 0.0  ;;  %v297_v60 = vsel %vm505_vm3, 1.0, %v383_v0 }
  0x36   :  { %v175_v61 = vrot.slane %v174_v59, 4  ;;  %v181_v62 = vsel %vm154_vm0, %v163_v53, 0.0  ;;  %v298_v63 = vsel %vm520_vm4, 1.0, %v383_v0  ;;  %v145_v1 = vadd.f32 %v291_v38, %v113_v17 }
  0x37   :  { %v169_v2 = vadd.f32 %v168_v58, %v167_v55  ;;  %v182_v3 = vrot.slane %v181_v62, 4  ;;  %v188_v4 = vsel %vm154_vm0, %v166_v57, 0.0  ;;  %vm199_vm2 = vcmask 1041409  }
  0x38   :  { %v146_v5 = vadd.f32 %v292_v42, %v114_v22  ;;  %v176_v6 = vadd.f32 %v175_v61, %v174_v59  ;;  %v189_v7 = vrot.slane %v188_v4, 4  ;;  %vm201_vm5 = vcmask 1042434  }
  0x39   :  { %v147_v8 = vadd.f32 %v293_v43, %v115_v23  ;;  %v148_v9 = vadd.f32 %v294_v48, %v116_v27  ;;  %v170_v10 = vrot.slane %v169_v2, 2  ;;  %v183_v11 = vadd.f32 %v182_v3, %v181_v62 }
  0x3a   :  { %vm203_vm6 = vcmask 1043459   ;;  %v149_v12 = vadd.f32 %v295_v52, %v117_v28  ;;  %v150_v13 = vadd.f32 %v296_v56, %v118_v32  ;;  %v177_v14 = vrot.slane %v176_v6, 2 }
  0x3b   :  { %v190_v15 = vadd.f32 %v189_v7, %v188_v4  ;;  %v151_v0 = vadd.f32 %v297_v60, %v119_v33  ;;  %v152_v16 = vadd.f32 %v298_v63, %v120_v37  ;;  %v171_v17 = vadd.f32 %v170_v10, %v169_v2 }
  0x3c   :  { %v184_v18 = vrot.slane %v183_v11, 2  ;;  %v209_v19 = vsel %vm154_vm0, %v145_v1, 0.0  ;;  %v210_v20 = vsel %vm154_vm0, %v149_v12, 0.0  ;;  %v178_v21 = vadd.f32 %v177_v14, %v176_v6  ;;  %v208_v12 = vld [vmem:[#allocation3] sm:$0xf] }
  0x3d   :  { %v191_v22 = vrot.slane %v190_v15, 2  ;;  %v211_v24 = vadd.f32 %v210_v20, %v209_v19  ;;  %v212_v23 = vsel %vm154_vm0, %v146_v5, 0.0  ;;  %v172_v25 = vrot.slane %v171_v17, 1 }
  0x3e   :  { %v185_v26 = vadd.f32 %v184_v18, %v183_v11  ;;  %v213_v27 = vsel %vm154_vm0, %v150_v13, 0.0  ;;  %v215_v28 = vsel %vm154_vm0, %v147_v8, 0.0  ;;  %v179_v29 = vrot.slane %v178_v21, 1 }
  0x3f   :  { %v192_v30 = vadd.f32 %v191_v22, %v190_v15  ;;  %v214_v31 = vadd.f32 %v213_v27, %v212_v23  ;;  %v216_v32 = vsel %vm154_vm0, %v151_v0, 0.0  ;;  %v173_v33 = vadd.f32 %v172_v25, %v171_v17 }
  0x40   :  { %v186_v34 = vrot.slane %v185_v26, 1  ;;  %v217_v35 = vadd.f32 %v216_v32, %v215_v28  ;;  %v218_v36 = vsel %vm154_vm0, %v148_v9, 0.0  ;;  %v180_v37 = vadd.f32 %v179_v29, %v178_v21 }
  0x41   :  { %v193_v38 = vrot.slane %v192_v30, 1  ;;  %v219_v39 = vsel %vm154_vm0, %v152_v16, 0.0  ;;  %v221_v40 = vsel %vm154_vm0, %v211_v24, 0.0  ;;  %v228_v44 = vsel %vm154_vm0, %v214_v31, 0.0 }
  0x42   :  { %v187_v41 = vadd.f32 %v186_v34, %v185_v26  ;;  %v220_v42 = vadd.f32 %v219_v39, %v218_v36  ;;  %v222_v43 = vrot.slane %v221_v40, 4  ;;  %v200_v47 = vsel %vm199_vm2, %v180_v37, %v173_v33 }
  0x43   :  { %v194_v46 = vadd.f32 %v193_v38, %v192_v30  ;;  %v229_v48 = vrot.slane %v228_v44, 4  ;;  %v235_v49 = vsel %vm154_vm0, %v217_v35, 0.0 }
  0x44   :  { %v202_v50 = vsel %vm201_vm5, %v187_v41, %v200_v47  ;;  %v223_v51 = vadd.f32 %v222_v43, %v221_v40  ;;  %v236_v52 = vrot.slane %v235_v49, 4  ;;  %v242_v53 = vsel %vm154_vm0, %v220_v42, 0.0 }
  0x45   :  { %v204_v54 = vsel %vm203_vm6, %v194_v46, %v202_v50  ;;  %v230_v55 = vadd.f32 %v229_v48, %v228_v44  ;;  %v243_v56 = vrot.slane %v242_v53, 4 }
  0x46   :  { %v206_v57 = vadd.f32 %v204_v54, %v153_v45  ;;  %v224_v58 = vrot.slane %v223_v51, 2  ;;  %v237_v59 = vadd.f32 %v236_v52, %v235_v49 }
  0x47   :  { %v231_v60 = vrot.slane %v230_v55, 2  ;;  %v244_v61 = vadd.f32 %v243_v56, %v242_v53 }
  0x48   :  { %207 = vst [vmem:[#allocation2] sm:$0xf] %v206_v57  ;;  %v225_v62 = vadd.f32 %v224_v58, %v223_v51  ;;  %v238_v63 = vrot.slane %v237_v59, 2 }
  0x49   :  { %v232_v1 = vadd.f32 %v231_v60, %v230_v55  ;;  %v245_v2 = vrot.slane %v244_v61, 2 }
  0x4a   :  { %v226_v3 = vrot.slane %v225_v62, 1  ;;  %v239_v4 = vadd.f32 %v238_v63, %v237_v59 }
  0x4b   :  { %v233_v5 = vrot.slane %v232_v1, 1  ;;  %v246_v6 = vadd.f32 %v245_v2, %v244_v61 }
  0x4c   :  { %v227_v7 = vadd.f32 %v226_v3, %v225_v62  ;;  %v240_v8 = vrot.slane %v239_v4, 1 }
  0x4d   :  { %v234_v9 = vadd.f32 %v233_v5, %v232_v1  ;;  %v247_v10 = vrot.slane %v246_v6, 1 }
  0x4e   :  { %v241_v11 = vadd.f32 %v240_v8, %v239_v4 }
  0x4f   :  { %v248_v13 = vadd.f32 %v247_v10, %v246_v6  ;;  %v253_v14 = vsel %vm199_vm2, %v234_v9, %v227_v7  ;;  %v262_v15 = vld [vmem:[#allocation2] sm:$0xf] }
  0x50   :  { %v254_v0 = vsel %vm201_vm5, %v241_v11, %v253_v14  ;;  %263 = vst [vmem:[#allocation9] sm:$0xf] %v262_v15 }
  0x51   :  { %v255_v16 = vsel %vm203_vm6, %v248_v13, %v254_v0 }
  0x52   :  { %v257_v17 = vadd.f32 %v255_v16, %v208_v12 }
  0x54   :  { %258 = vst [vmem:[#allocation3] sm:$0xf] %v257_v17 }
  0x5b   :  { %v264_v18 = vld [vmem:[#allocation3] sm:$0xf] }
  0x5c   :  { %266 = vst [vmem:[#allocation9 + $0x4] sm:$0xf] %v264_v18 }
  0x5d   :  { %362 = shalt.err (!%p359_p6)
}
  0x5e   :  { %s363_s21 = scalar_lea.hbm %s583_s3, 128 }
  0x5f   :  { %p364_p7 = scmp.ne.s32.totalorder %s583_s3, %s363_s21  ;;  %p367_p8 = scmp.lt.u32.totalorder %s363_s21, %s583_s3 }
  0x61   :  { %p369_p9 = pnand %p367_p8, %p364_p7 }
  0x63   :  { %372 = shalt.err (!%p369_p9)
}
  0x64   :  { %s385_s26 = smov 64   ;;  %s386_s27 = smov 4  }
  0x65   :  { %278 = dma.vmem_to_hbm [thread:$0]  %s273_s17, 128, %s583_s3, [#allocation6], %s385_s26, %s385_s26, %s386_s27  }
  0x66   :  { %377 = dma.done.wait [#allocation6], 128  }
  0x67   :  { %378 = vsyncadd [#allocation6], 4294967168 }
  0x68   :  { %282 = vsyncpa [#allocation5], 1 }
  0x69   :  { %283 = vsyncpa [#allocation8], 1 }
  0x6a   :  { %284 = vsyncpa [#allocation6], 1 }

</bundles_post_ra>
